<compile_context>
chip_gen: v6e
topology: v6e:2x2x1
jax: 0.10.0
libtpu: 0.0.40
codegen_flags: <defaults>
</compile_context>

<pallas_src>
import jax
import jax.numpy as jnp
from jax.experimental import pallas as pl
from jax.experimental.pallas import tpu as pltpu

_LANE = 128


def _round_up(x, m):
    return (x + m - 1) // m * m


def _mlp_kernel(x_ref, w1_ref, b1_ref, w2_ref, b2_ref, o_ref):
    # layer1: x @ W1 + b1, ReLU   (f32 accumulation on the MXU)
    h = jnp.dot(x_ref[...], w1_ref[...], preferred_element_type=jnp.float32)
    h = jnp.maximum(h + b1_ref[...], 0.0)          # [TB, Hp] + [1, Hp] broadcast
    # layer2: h @ W2 + b2, sigmoid * 4 + 1          (f32 epilogue — v5e-safe)
    y = jnp.dot(h, w2_ref[...], preferred_element_type=jnp.float32)
    y = y + b2_ref[...]                             # [TB, Op] + [1, Op] broadcast
    o_ref[...] = (jax.nn.sigmoid(y) * 4.0 + 1.0).astype(o_ref.dtype)


def simple_nn_forward(x, w1, b1, w2, b2, *, batch_tile=128):
    """x: [B, in], w1: [in, hidden], b1: [1, hidden], w2: [hidden, out], b2: [1, out]."""
    B, in_size = x.shape
    hidden = w1.shape[1]
    out_size = w2.shape[1]

    # Pad hidden & output feature dims to full 128-lane tiles (lane-dense stores),
    # pad the batch to a multiple of the batch tile.
    h_pad = _round_up(hidden, _LANE)
    o_pad = _round_up(out_size, _LANE)
    tb = min(batch_tile, _round_up(B, 8))
    b_pad = _round_up(B, tb)

    xp = jnp.pad(x, ((0, b_pad - B), (0, 0)))
    w1p = jnp.pad(w1, ((0, 0), (0, h_pad - hidden)))
    b1p = jnp.pad(b1, ((0, 0), (0, h_pad - hidden)))
    w2p = jnp.pad(w2, ((0, h_pad - hidden), (0, o_pad - out_size)))
    b2p = jnp.pad(b2, ((0, 0), (0, o_pad - out_size)))

    grid = (b_pad // tb,)

    out_padded = pl.pallas_call(
        _mlp_kernel,
        out_shape=jax.ShapeDtypeStruct((b_pad, o_pad), jnp.float32),
        grid_spec=pltpu.PrefetchScalarGridSpec(
            num_scalar_prefetch=0,
            grid=grid,
            in_specs=[
                pl.BlockSpec((tb, in_size), lambda i: (i, 0)),     # streamed x tiles
                pl.BlockSpec((in_size, h_pad), lambda i: (0, 0)),  # resident weights
                pl.BlockSpec((1, h_pad), lambda i: (0, 0)),
                pl.BlockSpec((h_pad, o_pad), lambda i: (0, 0)),
                pl.BlockSpec((1, o_pad), lambda i: (0, 0)),
            ],
            out_specs=pl.BlockSpec((tb, o_pad), lambda i: (i, 0)),  # lane-dense output
        ),
        compiler_params=pltpu.CompilerParams(
            dimension_semantics=("parallel",),   # shard batch tiles across TCs (v7x)
        ),
    )(xp, w1p, b1p, w2p, b2p)

    return out_padded[:B, :out_size]


def init_params(key, input_size, hidden_size, output_size):
    # Deterministic init mimicking nn.Linear's uniform(-1/sqrt(fan_in), 1/sqrt(fan_in)).
    k1, k2, k3, k4 = jax.random.split(key, 4)
    bound1 = 1.0 / jnp.sqrt(input_size)
    bound2 = 1.0 / jnp.sqrt(hidden_size)
    w1 = jax.random.uniform(k1, (input_size, hidden_size), jnp.float32, -bound1, bound1)
    b1 = jax.random.uniform(k2, (1, hidden_size), jnp.float32, -bound1, bound1)
    w2 = jax.random.uniform(k3, (hidden_size, output_size), jnp.float32, -bound2, bound2)
    b2 = jax.random.uniform(k4, (1, output_size), jnp.float32, -bound2, bound2)
    return w1, b1, w2, b2


if __name__ == "__main__":
    key = jax.random.PRNGKey(0)
    kx, kp = jax.random.split(key)

    # Batch chosen so the grid has multiple tiles (pipelining + megacore sharding);
    # the wrapper also handles small / ragged batches by padding.
    batch, input_size, hidden_size, output_size = 256, 32, 64, 16
    x = jax.random.normal(kx, (batch, input_size), jnp.float32)
    w1, b1, w2, b2 = init_params(kp, input_size, hidden_size, output_size)

    out = simple_nn_forward(x, w1, b1, w2, b2)
    jax.block_until_ready(out)

    # Pure-JAX reference check.
    ref = jax.nn.sigmoid(jnp.maximum(x @ w1 + b1, 0.0) @ w2 + b2) * 4.0 + 1.0
    assert out.shape == (batch, output_size)
    assert jnp.allclose(out, ref, atol=1e-5), "mismatch vs reference"

    print("KERNEL_OK")
</pallas_src>

<mosaic_0001>
module attributes {stable_mosaic.version = 11 : i64} {
  func.func @_mlp_kernel(%arg0: i32, %arg1: memref<128x32xf32, #tpu.memory_space<vmem>>, %arg2: memref<32x128xf32, #tpu.memory_space<vmem>>, %arg3: memref<1x128xf32, #tpu.memory_space<vmem>>, %arg4: memref<128x128xf32, #tpu.memory_space<vmem>>, %arg5: memref<1x128xf32, #tpu.memory_space<vmem>>, %arg6: memref<128x128xf32, #tpu.memory_space<vmem>>) attributes {dimension_semantics = [#tpu.dimension_semantics<parallel>], iteration_bounds = array<i64: 2>, scalar_prefetch = 0 : i64, scratch_operands = 0 : i64, tpu.core_type = #tpu.core_type<tc>, window_params = [{transform_indices = @transform_0, window_bounds = array<i64: 128, 32>}, {pipeline_mode = #tpu.pipeline_mode<synchronous>, transform_indices = @transform_1, window_bounds = array<i64: 32, 128>}, {pipeline_mode = #tpu.pipeline_mode<synchronous>, transform_indices = @transform_2, window_bounds = array<i64: 1, 128>}, {pipeline_mode = #tpu.pipeline_mode<synchronous>, transform_indices = @transform_3, window_bounds = array<i64: 128, 128>}, {pipeline_mode = #tpu.pipeline_mode<synchronous>, transform_indices = @transform_4, window_bounds = array<i64: 1, 128>}, {transform_indices = @transform_5, window_bounds = array<i64: 128, 128>}]} {
    %c0 = arith.constant 0 : index
    %c0_0 = arith.constant 0 : index
    %0 = vector.load %arg1[%c0, %c0_0] : memref<128x32xf32, #tpu.memory_space<vmem>>, vector<128x32xf32>
    %c0_1 = arith.constant 0 : index
    %c0_2 = arith.constant 0 : index
    %1 = vector.load %arg2[%c0_1, %c0_2] : memref<32x128xf32, #tpu.memory_space<vmem>>, vector<32x128xf32>
    %cst = arith.constant dense<0.000000e+00> : vector<128x128xf32>
    %2 = tpu.matmul %0, %1, %cst {dimension_numbers = #tpu.dot_dimension_numbers<[1], [0], [0], [1], [0, 0, 1, 1], [], []>} : vector<128x32xf32>, vector<32x128xf32>, vector<128x128xf32> -> vector<128x128xf32>
    %c0_3 = arith.constant 0 : index
    %c0_4 = arith.constant 0 : index
    %3 = vector.load %arg3[%c0_3, %c0_4] : memref<1x128xf32, #tpu.memory_space<vmem>>, vector<1x128xf32>
    %4 = vector.broadcast %3 : vector<1x128xf32> to vector<128x128xf32>
    %5 = arith.addf %2, %4 : vector<128x128xf32>
    %cst_5 = arith.constant 0.000000e+00 : f32
    %6 = vector.broadcast %cst_5 : f32 to vector<128x128xf32>
    %7 = arith.maximumf %5, %6 : vector<128x128xf32>
    %c0_6 = arith.constant 0 : index
    %c0_7 = arith.constant 0 : index
    %8 = vector.load %arg4[%c0_6, %c0_7] : memref<128x128xf32, #tpu.memory_space<vmem>>, vector<128x128xf32>
    %cst_8 = arith.constant dense<0.000000e+00> : vector<128x128xf32>
    %9 = tpu.matmul %7, %8, %cst_8 {dimension_numbers = #tpu.dot_dimension_numbers<[1], [0], [0], [1], [0, 0, 1, 1], [], []>} : vector<128x128xf32>, vector<128x128xf32>, vector<128x128xf32> -> vector<128x128xf32>
    %c0_9 = arith.constant 0 : index
    %c0_10 = arith.constant 0 : index
    %10 = vector.load %arg5[%c0_9, %c0_10] : memref<1x128xf32, #tpu.memory_space<vmem>>, vector<1x128xf32>
    %11 = vector.broadcast %10 : vector<1x128xf32> to vector<128x128xf32>
    %12 = arith.addf %9, %11 : vector<128x128xf32>
    %13 = arith.negf %12 : vector<128x128xf32>
    %14 = math.exp %13 : vector<128x128xf32>
    %cst_11 = arith.constant 1.000000e+00 : f32
    %15 = vector.broadcast %cst_11 : f32 to vector<128x128xf32>
    %16 = arith.addf %15, %14 : vector<128x128xf32>
    %17 = arith.divf %15, %16 : vector<128x128xf32>
    %cst_12 = arith.constant 4.000000e+00 : f32
    %18 = vector.broadcast %cst_12 : f32 to vector<128x128xf32>
    %19 = arith.mulf %17, %18 : vector<128x128xf32>
    %cst_13 = arith.constant 1.000000e+00 : f32
    %20 = vector.broadcast %cst_13 : f32 to vector<128x128xf32>
    %21 = arith.addf %19, %20 : vector<128x128xf32>
    %c0_14 = arith.constant 0 : index
    %c0_15 = arith.constant 0 : index
    %22 = vector.load %arg6[%c0_14, %c0_15] : memref<128x128xf32, #tpu.memory_space<vmem>>, vector<128x128xf32>
    tpu.vector_store %arg6[%c0_14, %c0_15], %21 {strides = array<i32>} : memref<128x128xf32, #tpu.memory_space<vmem>>, vector<128x128xf32>,
    return
  }
  func.func @transform_0(%arg0: i32) -> (i32, i32) {
    %c0_i32 = arith.constant 0 : i32
    %c0_i32_0 = arith.constant 0 : i32
    return %arg0, %c0_i32 : i32, i32
  }
  func.func @transform_1(%arg0: i32) -> (i32, i32) {
    %c0_i32 = arith.constant 0 : i32
    %c0_i32_0 = arith.constant 0 : i32
    %c0_i32_1 = arith.constant 0 : i32
    return %c0_i32, %c0_i32_0 : i32, i32
  }
  func.func @transform_2(%arg0: i32) -> (i32, i32) {
    %c0_i32 = arith.constant 0 : i32
    %c0_i32_0 = arith.constant 0 : i32
    %c0_i32_1 = arith.constant 0 : i32
    return %c0_i32, %c0_i32_0 : i32, i32
  }
  func.func @transform_3(%arg0: i32) -> (i32, i32) {
    %c0_i32 = arith.constant 0 : i32
    %c0_i32_0 = arith.constant 0 : i32
    %c0_i32_1 = arith.constant 0 : i32
    return %c0_i32, %c0_i32_0 : i32, i32
  }
  func.func @transform_4(%arg0: i32) -> (i32, i32) {
    %c0_i32 = arith.constant 0 : i32
    %c0_i32_0 = arith.constant 0 : i32
    %c0_i32_1 = arith.constant 0 : i32
    return %c0_i32, %c0_i32_0 : i32, i32
  }
  func.func @transform_5(%arg0: i32) -> (i32, i32) {
    %c0_i32 = arith.constant 0 : i32
    %c0_i32_0 = arith.constant 0 : i32
    return %arg0, %c0_i32 : i32, i32
  }
}

</mosaic_0001>

<bundles_post_ra>
// kernel: tpu_custom_call.1
= control target key start
LH: loop header
LB: loop body
LE: loop exit
PB: predicated region body
PF: predicated region fallthrough
CT: control target
= control target key end

     0   :  { %10 = vsyncpa [#allocation3], 0  ;;  %s1512_s0 = inlined_call_operand.vmem [shape: f32[256,32], index: 0, kind: input, shape index: {}]   ;;  %s1513_s1 = inlined_call_operand.vmem [shape: f32[32,128], index: 1, kind: input, shape index: {}]   ;;  %s1514_s2 = inlined_call_operand.vmem [shape: f32[1,128], index: 2, kind: input, shape index: {}]   ;;  %s1515_s3 = inlined_call_operand.vmem [shape: f32[128,128], index: 3, kind: input, shape index: {}]   ;;  %s1516_s4 = inlined_call_operand.vmem [shape: f32[1,128], index: 4, kind: input, shape index: {}]   ;;  %s1517_s5 = inlined_call_operand.hbm [shape: f32[256,128], index: 5, kind: output, shape index: {}]  }
   0x1   :  { %12 = vsyncpa [#allocation3 + $0x1], 0  ;;  %s1270_s18 = smov 0   ;;  %s1272_s19 = smov 0  }
   0x2   :  { %s1274_s20 = smov 0   ;;  %s1276_s21 = smov 0  }
   0x3 LB: > { %s1291_s22 = sadd.s32 4294967295, %s1235_s21   ;;  %s851_s23 = sadd.s32 4294967294, %s1235_s21   ;;  %s1235_s21 = sphi %s1276_s21, %s1523_s21   ;;  %s1231_s20 = sphi %s1274_s20, %s1522_s20   ;;  %s1227_s19 = sphi %s1272_s19, %s1521_s19   ;;  %s1223_s18 = sphi %s1270_s18, %s1520_s18  }
   0x4   : > { %s1295_s24 = sadd.s32 1, %s1235_s21   ;;  %s135_s25 = sadd.s32 1, %s1231_s20 }
   0x5   : > { %s132_s26 = ssub.s32 %s1235_s21, %s1295_s24  ;;  %p145_p0 = scmp.ne.s32.totalorder %s1231_s20, %s1227_s19 }
   0x6   : > { %p133_p1 = scmp.eq.s32.totalorder %s132_s26, 0  ;;  %p146_p2 = scmp.eq.s32.totalorder %s1291_s22, 1 }
   0x7   : > { %p151_p3 = scmp.ne.s32.totalorder %s1227_s19, %s1223_s18  ;;  %p152_p4 = scmp.eq.s32.totalorder %s851_s23, 1 }
   0x8   : > { %s1306_s27 = scalar_select %p133_p1, %s1231_s20, %s135_s25  }
   0x9   : > { %p1308_p5 = por %p146_p2, %p145_p0  ;;  %p1312_p6 = por %p152_p4, %p151_p3 }
   0xa   : > { %p854_p7 = scmp.ge.s32.totalorder %s1235_s21, 1  ;;  %p191_p8 = scmp.lt.s32.totalorder %s1235_s21, 3 }
   0xc   : > { %p192_p9 = pnand %p854_p7, %p191_p8 }
   0xd   : > { %s856_s9 = sshll.u32 (!%p192_p9), %s1291_s22, 4  ;;  %s216_s6 = sand.u32 (!%p192_p9), 1, %s1227_s19  }
   0xe   : > { %195 = sbr.rel (%p192_p9) target bundleno = 504 (0x1f8), region = 40  ;;  %p220_p10 = scmp.lt.s32.totalorder (!%p192_p9), %s856_s9, 31 }
   0xf   : > { %s855_s8 = sshll.u32 (!%p192_p9), %s216_s6, 7  ;;  %s897_s10 = sshll.u32 (!%p192_p9), %s1291_s22, 11 }
  0x10   : > { %s1464_s14 = scalar_lea.hbm (!%p192_p9), %s1517_s5, %s897_s10  ;;  %s1472_s22 = scalar_lea.sflag (!%p192_p9), [#allocation3], %s216_s6 }
  0x11   : > { %s1237_s15 = smov (!%p192_p9), [#allocation2]  }
  0x12   : > { %s1179_s16 = sshll.u32 (!%p192_p9), %s1237_s15, 4  ;;  %s1180_s16 = int_to_ptr.vmem [resolvable:$false] %s1179_s16 }
  0x13   : > { %v245_v0 = vld [vmem:[%s1513_s1 + $0x18] sm:$0xff]  ;;  %v244_v1 = vld [vmem:[%s1513_s1 + $0x10] sm:$0xff]  ;;  %v243_v3 = vld [vmem:[%s1513_s1 + $0x8] sm:$0xff]  ;;  %s1525_s9 = smov (!%p220_p10, %s856_s9), 31  ;;  %vm253_vm0 = vcmask 261120   ;;  %s1181_s17 = scalar_lea.vmem %s1180_s16, 4096 }
  0x14   : > { %950 = vmatprep.subr.mxu0 %v245_v0  ;;  %v478_v2 = vld [vmem:[%s1515_s3 + $0x78] sm:$0xff]  ;;  %v477_v4 = vld [vmem:[%s1515_s3 + $0x70] sm:$0xff]  ;;  %v242_v5 = vld [vmem:[%s1513_s1] sm:$0xff]  ;;  %s857_s23 = sshll.u32 %s1525_s9, 3  ;;  %s1443_s9 = scalar_lea.vmem [#allocation2], %s855_s8 }
  0x15   : > { %951 = vmatpush3.msra.mxu0 %v245_v0  ;;  %1038 = vmatprep.subr.mxu1 %v478_v2  ;;  %v476_v6 = vld [vmem:[%s1515_s3 + $0x68] sm:$0xff]  ;;  %s1343_s7 = scalar_lea.vmem %s1512_s0, %s857_s23  ;;  %v475_v11 = vld [vmem:[%s1515_s3 + $0x60] sm:$0xff]  ;;  %v474_v14 = vld [vmem:[%s1515_s3 + $0x58] sm:$0xff]  ;;  %s789_s11 = sshll.u32 %s1443_s9, 4  ;;  %s1466_s11 = int_to_ptr.vmem [resolvable:$true] %s789_s11 }
  0x16   : > { %952 = vmatprep.subr.mxu0 %v244_v1  ;;  %1054 = vmatpush3.msra.mxu1 %v478_v2  ;;  %v226_v7 = vld [vmem:[%s1343_s7] sm:$0xff]  ;;  %v227_v8 = vld [vmem:[%s1343_s7 + $0x8] sm:$0xff]  ;;  %v228_v9 = vld [vmem:[%s1343_s7 + $0x10] sm:$0xff]  ;;  %p1182_p0 = scmp.lt.s32.totalorder %s1466_s11, %s1180_s16 }
  0x17   : > { %953 = vmatpush3.msra.mxu0 %v244_v1  ;;  %1039 = vmatprep.subr.mxu1 %v477_v4  ;;  %v229_v10 = vld [vmem:[%s1343_s7 + $0x18] sm:$0xff]  ;;  %v230_v12 = vld [vmem:[%s1343_s7 + $0x20] sm:$0xff]  ;;  %v231_v13 = vld [vmem:[%s1343_s7 + $0x28] sm:$0xff] }
  0x18   : > { %954 = vmatprep.subr.mxu0 %v243_v3  ;;  %1055 = vmatpush3.msra.mxu1 %v477_v4  ;;  %v232_v15 = vld [vmem:[%s1343_s7 + $0x30] sm:$0xff]  ;;  %v233_v17 = vld [vmem:[%s1343_s7 + $0x38] sm:$0xff]  ;;  %v472_v18 = vld [vmem:[%s1515_s3 + $0x48] sm:$0xff] }
  0x19   : > { %955 = vmatpush3.msra.mxu0 %v243_v3  ;;  %1040 = vmatprep.subr.mxu1 %v476_v6  ;;  %v473_v16 = vld [vmem:[%s1515_s3 + $0x50] sm:$0xff]  ;;  %v234_v19 = vld [vmem:[%s1343_s7 + $0x40] sm:$0xff]  ;;  %v235_v21 = vld [vmem:[%s1343_s7 + $0x48] sm:$0xff] }
  0x1a   : > { %956 = vmatprep.subr.mxu0 %v242_v5  ;;  %1056 = vmatpush3.msra.mxu1 %v476_v6  ;;  %v471_v20 = vld [vmem:[%s1515_s3 + $0x40] sm:$0xff]  ;;  %v470_v22 = vld [vmem:[%s1515_s3 + $0x38] sm:$0xff]  ;;  %v236_v23 = vld [vmem:[%s1343_s7 + $0x50] sm:$0xff] }
  0x1b   : > { %957 = vmatpush3.msra.mxu0 %v242_v5  ;;  %958 = vmatprep.mubr.msk.f32.mxu0 %vm253_vm0, %v226_v7  ;;  %v469_v24 = vld [vmem:[%s1515_s3 + $0x30] sm:$0xff]  ;;  %v237_v25 = vld [vmem:[%s1343_s7 + $0x58] sm:$0xff]  ;;  %v468_v26 = vld [vmem:[%s1515_s3 + $0x28] sm:$0xff] }
  0x1c   : > { %959 = vmatmul.mubr.msk.f32.vlgmr.msra.gmra.mxu0 %vm253_vm0, %v227_v8  ;;  %982 = vmatprep.subr.mxu0 %v478_v2  ;;  %v238_v27 = vld [vmem:[%s1343_s7 + $0x60] sm:$0xff]  ;;  %v239_v29 = vld [vmem:[%s1343_s7 + $0x68] sm:$0xff]  ;;  %v240_v30 = vld [vmem:[%s1343_s7 + $0x70] sm:$0xff] }
  0x1d   : > { %961 = vmatprep.mubr.msk.f32.mxu0 %vm253_vm0, %v228_v9  ;;  %983 = vmatpush3.msra.mxu0 %v478_v2  ;;  %v467_v28 = vld [vmem:[%s1515_s3 + $0x20] sm:$0xff]  ;;  %v241_v31 = vld [vmem:[%s1343_s7 + $0x78] sm:$0xff]  ;;  %v465_v33 = vld [vmem:[%s1515_s3 + $0x10] sm:$0xff]  ;;  %s1175_s7 = scalar_lea.vmem %s1466_s11, 2048 }
  0x1e   : > { %984 = vmatprep.subr.mxu0 %v477_v4  ;;  %1041 = vmatprep.subr.mxu1 %v475_v11  ;;  %v466_v32 = vld [vmem:[%s1515_s3 + $0x18] sm:$0xff]  ;;  %v464_v34 = vld [vmem:[%s1515_s3 + $0x8] sm:$0xff]  ;;  %v463_v35 = vld [vmem:[%s1515_s3] sm:$0xff]  ;;  %p1176_p11 = scmp.ne.s32.totalorder %s1466_s11, %s1175_s7  ;;  %p1183_p1 = scmp.lt.s32.totalorder %s1181_s17, %s1175_s7 }
  0x1f   : > { %985 = vmatpush3.msra.mxu0 %v477_v4  ;;  %1057 = vmatpush3.msra.mxu1 %v475_v11  ;;  %v858_v36 = vld [vmem:[%s1514_s2] ss:$0 sm:$0xff] }
  0x20   : > { %962 = vmatmul.mubr.msk.f32.gmra.mxu0 %vm253_vm0, %v229_v10  ;;  %986 = vmatprep.subr.mxu0 %v476_v6  ;;  %p1177_p12 = pnand %p1176_p11, %p1308_p5  ;;  %p1184_p2 = por %p1183_p1, %p1182_p0 }
  0x21   : > { %964 = vmatprep.mubr.msk.f32.mxu0 %vm253_vm0, %v230_v12  ;;  %987 = vmatpush3.msra.mxu0 %v476_v6 }
  0x22   : > { %988 = vmatprep.subr.mxu0 %v475_v11  ;;  %1042 = vmatprep.subr.mxu1 %v474_v14  ;;  %p1178_p13 = pneg %p1177_p12 }
  0x23   : > { %989 = vmatpush3.msra.mxu0 %v475_v11  ;;  %1058 = vmatpush3.msra.mxu1 %v474_v14 }
  0x24   : > { %965 = vmatmul.mubr.msk.f32.gmra.mxu0 %vm253_vm0, %v231_v13  ;;  %990 = vmatprep.subr.mxu0 %v474_v14  ;;  %p1185_p3 = pnand %p1184_p2, %p1178_p13 }
  0x25   : > { %967 = vmatprep.mubr.msk.f32.mxu0 %vm253_vm0, %v232_v15  ;;  %991 = vmatpush3.msra.mxu0 %v474_v14 }
  0x26   : > { %992 = vmatprep.subr.mxu0 %v473_v16  ;;  %1043 = vmatprep.subr.mxu1 %v473_v16 }
  0x27   : > { %993 = vmatpush3.msra.mxu0 %v473_v16  ;;  %1059 = vmatpush3.msra.mxu1 %v473_v16 }
  0x28   : > { %968 = vmatmul.mubr.msk.f32.gmra.mxu0 %vm253_vm0, %v233_v17  ;;  %994 = vmatprep.subr.mxu0 %v472_v18 }
  0x29   : > { %970 = vmatprep.mubr.msk.f32.mxu0 %vm253_vm0, %v234_v19  ;;  %995 = vmatpush3.msra.mxu0 %v472_v18 }
  0x2a   : > { %996 = vmatprep.subr.mxu0 %v471_v20  ;;  %1044 = vmatprep.subr.mxu1 %v472_v18 }
  0x2b   : > { %997 = vmatpush3.msra.mxu0 %v471_v20  ;;  %1060 = vmatpush3.msra.mxu1 %v472_v18 }
  0x2c   : > { %971 = vmatmul.mubr.msk.f32.gmra.mxu0 %vm253_vm0, %v235_v21  ;;  %998 = vmatprep.subr.mxu0 %v470_v22  ;;  %v1422_v21 = vld [vmem:[%s1516_s4] ss:$0 sm:$0xff] }
  0x2d   : > { %973 = vmatprep.mubr.msk.f32.mxu0 %vm253_vm0, %v236_v23  ;;  %999 = vmatpush3.msra.mxu0 %v470_v22 }
  0x2e   : > { %1000 = vmatprep.subr.mxu0 %v469_v24  ;;  %1045 = vmatprep.subr.mxu1 %v471_v20 }
  0x2f   : > { %1001 = vmatpush3.msra.mxu0 %v469_v24  ;;  %1061 = vmatpush3.msra.mxu1 %v471_v20 }
  0x30   : > { %974 = vmatmul.mubr.msk.f32.gmra.mxu0 %vm253_vm0, %v237_v25  ;;  %1002 = vmatprep.subr.mxu0 %v468_v26 }
  0x31   : > { %976 = vmatprep.mubr.msk.f32.mxu0 %vm253_vm0, %v238_v27  ;;  %1003 = vmatpush3.msra.mxu0 %v468_v26 }
  0x32   : > { %1004 = vmatprep.subr.mxu0 %v467_v28  ;;  %1046 = vmatprep.subr.mxu1 %v470_v22 }
  0x33   : > { %1005 = vmatpush3.msra.mxu0 %v467_v28  ;;  %1062 = vmatpush3.msra.mxu1 %v470_v22 }
  0x34   : > { %977 = vmatmul.mubr.msk.f32.gmra.mxu0 %vm253_vm0, %v239_v29  ;;  %1047 = vmatprep.subr.mxu1 %v469_v24 }
  0x35   : > { %979 = vmatprep.mubr.msk.f32.mxu0 %vm253_vm0, %v240_v30  ;;  %1063 = vmatpush3.msra.mxu1 %v469_v24 }
  0x36   : > { %1048 = vmatprep.subr.mxu1 %v468_v26  ;;  %1006 = vmatprep.subr.mxu0 %v466_v32 }
  0x37   : > { %1064 = vmatpush3.msra.mxu1 %v468_v26  ;;  %1007 = vmatpush3.msra.mxu0 %v466_v32 }
  0x38   : > { %980 = vmatmul.mubr.msk.f32.gmra.mxu0 %vm253_vm0, %v241_v31  ;;  %1049 = vmatprep.subr.mxu1 %v467_v28 }
  0x39   : > { %1065 = vmatpush3.msra.mxu1 %v467_v28  ;;  %1008 = vmatprep.subr.mxu0 %v465_v33 }
  0x3a   : > { %1050 = vmatprep.subr.mxu1 %v466_v32  ;;  %1009 = vmatpush3.msra.mxu0 %v465_v33 }
  0x3b   : > { %1066 = vmatpush3.msra.mxu1 %v466_v32  ;;  %1010 = vmatprep.subr.mxu0 %v464_v34 }
  0x3c   : > { %1051 = vmatprep.subr.mxu1 %v465_v33  ;;  %1011 = vmatpush3.msra.mxu0 %v464_v34 }
  0x3d   : > { %1067 = vmatpush3.msra.mxu1 %v465_v33  ;;  %1012 = vmatprep.subr.mxu0 %v463_v35 }
  0x3e   : > { %1052 = vmatprep.subr.mxu1 %v464_v34  ;;  %1013 = vmatpush3.msra.mxu0 %v463_v35 }
  0x3f   : > { %1068 = vmatpush3.msra.mxu1 %v464_v34 }
  0x40   : > { %1053 = vmatprep.subr.mxu1 %v463_v35 }
  0x41   : > { %1069 = vmatpush3.msra.mxu1 %v463_v35 }
  0xdc   : > { %v960_v37 = vpop.f32.mrf.mxu0 }
  0xdd   : > { %v374_v38 = vadd.f32 %v960_v37, %v858_v36 }
  0xde   : > { %v368_v39 = vpop.f32.mrf.mxu0 }
  0xdf   : > { %v369_v40 = vadd.f32 %v858_v36, %v368_v39  ;;  %v448_v43 = vmax.f32 %v374_v38, 0.0 }
  0xe0   : > { %v963_v41 = vpop.f32.mrf.mxu0 }
  0xe1   : > { %v447_v42 = vmax.f32 %v369_v40, 0.0  ;;  %v384_v44 = vadd.f32 %v963_v41, %v858_v36 }
  0xe2   : > { %v378_v45 = vpop.f32.mrf.mxu0 }
  0xe3   : > { %v379_v46 = vadd.f32 %v858_v36, %v378_v45  ;;  %1014 = vmatprep.mubr.f32.mxu0 %v447_v42  ;;  %v450_v49 = vmax.f32 %v384_v44, 0.0 }
  0xe4   : > { %v966_v47 = vpop.f32.mrf.mxu0  ;;  %1015 = vmatmul.mubr.f32.vlgmr.msra.gmra.mxu0 %v448_v43 }
  0xe5   : > { %v449_v48 = vmax.f32 %v379_v46, 0.0  ;;  %v394_v50 = vadd.f32 %v966_v47, %v858_v36 }
  0xe6   : > { %v388_v51 = vpop.f32.mrf.mxu0 }
  0xe7   : > { %v389_v52 = vadd.f32 %v858_v36, %v388_v51  ;;  %1017 = vmatprep.mubr.f32.mxu0 %v449_v48  ;;  %v452_v55 = vmax.f32 %v394_v50, 0.0 }
  0xe8   : > { %v969_v53 = vpop.f32.mrf.mxu0  ;;  %1018 = vmatmul.mubr.f32.gmra.mxu0 %v450_v49 }
  0xe9   : > { %v451_v54 = vmax.f32 %v389_v52, 0.0  ;;  %v404_v56 = vadd.f32 %v969_v53, %v858_v36 }
  0xea   : > { %v398_v57 = vpop.f32.mrf.mxu0 }
  0xeb   : > { %1020 = vmatprep.mubr.f32.mxu0 %v451_v54  ;;  %v399_v58 = vadd.f32 %v858_v36, %v398_v57  ;;  %v454_v61 = vmax.f32 %v404_v56, 0.0 }
  0xec   : > { %v972_v59 = vpop.f32.mrf.mxu0  ;;  %1021 = vmatmul.mubr.f32.gmra.mxu0 %v452_v55 }
  0xed   : > { %v453_v60 = vmax.f32 %v399_v58, 0.0  ;;  %v414_v62 = vadd.f32 %v972_v59, %v858_v36 }
  0xee   : > { %v408_v63 = vpop.f32.mrf.mxu0 }
  0xef   : > { %v409_v0 = vadd.f32 %v858_v36, %v408_v63  ;;  %1023 = vmatprep.mubr.f32.mxu1 %v453_v60  ;;  %v456_v3 = vmax.f32 %v414_v62, 0.0 }
  0xf0   : > { %v975_v1 = vpop.f32.mrf.mxu0  ;;  %1024 = vmatmul.mubr.f32.vlgmr.msra.gmra.mxu1 %v454_v61 }
  0xf1   : > { %v455_v2 = vmax.f32 %v409_v0, 0.0  ;;  %v424_v4 = vadd.f32 %v975_v1, %v858_v36 }
  0xf2   : > { %v418_v5 = vpop.f32.mrf.mxu0 }
  0xf3   : > { %v419_v6 = vadd.f32 %v858_v36, %v418_v5  ;;  %1026 = vmatprep.mubr.f32.mxu1 %v455_v2  ;;  %v458_v9 = vmax.f32 %v424_v4, 0.0 }
  0xf4   : > { %v978_v7 = vpop.f32.mrf.mxu0  ;;  %1027 = vmatmul.mubr.f32.gmra.mxu1 %v456_v3 }
  0xf5   : > { %v457_v8 = vmax.f32 %v419_v6, 0.0  ;;  %v434_v10 = vadd.f32 %v978_v7, %v858_v36 }
  0xf6   : > { %v428_v11 = vpop.f32.mrf.mxu0 }
  0xf7   : > { %v429_v12 = vadd.f32 %v858_v36, %v428_v11  ;;  %1029 = vmatprep.mubr.f32.mxu1 %v457_v8  ;;  %v460_v15 = vmax.f32 %v434_v10, 0.0 }
  0xf8   : > { %v981_v13 = vpop.f32.mrf.mxu0  ;;  %1030 = vmatmul.mubr.f32.gmra.mxu1 %v458_v9 }
  0xf9   : > { %v459_v14 = vmax.f32 %v429_v12, 0.0  ;;  %v444_v16 = vadd.f32 %v981_v13, %v858_v36 }
  0xfa   : > { %v438_v17 = vpop.f32.mrf.mxu0 }
  0xfb   : > { %v439_v18 = vadd.f32 %v858_v36, %v438_v17  ;;  %1032 = vmatprep.mubr.f32.mxu1 %v459_v14  ;;  %v462_v20 = vmax.f32 %v444_v16, 0.0 }
  0xfc   : > { %1033 = vmatmul.mubr.f32.gmra.mxu1 %v460_v15 }
  0xfd   : > { %v461_v19 = vmax.f32 %v439_v18, 0.0 }
  0xff   : > { %1035 = vmatprep.mubr.f32.mxu1 %v461_v19 }
 0x100   : > { %1036 = vmatmul.mubr.f32.gmra.mxu1 %v462_v20 }
 0x1a4   : > { %v1016_v22 = vpop.f32.mrf.mxu0 }
 0x1a5   : > { %v558_v23 = vadd.f32 %v1016_v22, %v1422_v21 }
 0x1a6   : > { %v552_v24 = vpop.f32.mrf.mxu0 }
 0x1a7   : > { %v877_v25 = vmul.f32 -1.442695, %v558_v23  ;;  %v553_v26 = vadd.f32 %v1422_v21, %v552_v24 }
 0x1a8   : > { %v1019_v27 = vpop.f32.mrf.mxu0 }
 0x1a9   : > { %1111 = vpow2.f32 %v877_v25  ;;  %v876_v28 = vmul.f32 -1.442695, %v553_v26  ;;  %v568_v29 = vadd.f32 %v1019_v27, %v1422_v21 }
 0x1aa   : > { %v562_v30 = vpop.f32.mrf.mxu0 }
 0x1ab   : > { %1113 = vpow2.f32 %v876_v28  ;;  %v879_v31 = vmul.f32 -1.442695, %v568_v29  ;;  %v563_v32 = vadd.f32 %v1422_v21, %v562_v30 }
 0x1ac   : > { %v1022_v33 = vpop.f32.mrf.mxu0 }
 0x1ad   : > { %1115 = vpow2.f32 %v879_v31  ;;  %v878_v34 = vmul.f32 -1.442695, %v563_v32  ;;  %v578_v35 = vadd.f32 %v1022_v33, %v1422_v21 }
 0x1ae   : > { %v572_v36 = vpop.f32.mrf.mxu0 }
 0x1af   : > { %1117 = vpow2.f32 %v878_v34  ;;  %v881_v37 = vmul.f32 -1.442695, %v578_v35  ;;  %v573_v38 = vadd.f32 %v1422_v21, %v572_v36 }
 0x1b0   : > { %v1025_v39 = vpop.f32.mrf.mxu1 }
 0x1b1   : > { %1119 = vpow2.f32 %v881_v37  ;;  %v880_v40 = vmul.f32 -1.442695, %v573_v38  ;;  %v588_v41 = vadd.f32 %v1025_v39, %v1422_v21 }
 0x1b2   : > { %v582_v42 = vpop.f32.mrf.mxu1 }
 0x1b3   : > { %1121 = vpow2.f32 %v880_v40  ;;  %v883_v43 = vmul.f32 -1.442695, %v588_v41  ;;  %v583_v44 = vadd.f32 %v1422_v21, %v582_v42 }
 0x1b4   : > { %v1028_v45 = vpop.f32.mrf.mxu1 }
 0x1b5   : > { %1123 = vpow2.f32 %v883_v43  ;;  %v882_v46 = vmul.f32 -1.442695, %v583_v44  ;;  %v598_v47 = vadd.f32 %v1028_v45, %v1422_v21 }
 0x1b6   : > { %v1112_v48 = vpop.eup %1111  ;;  %v592_v49 = vpop.f32.mrf.mxu1 }
 0x1b7   : > { %v680_v50 = vadd.f32 1.0, %v1112_v48  ;;  %1125 = vpow2.f32 %v882_v46  ;;  %v885_v51 = vmul.f32 -1.442695, %v598_v47  ;;  %v593_v52 = vadd.f32 %v1422_v21, %v592_v49 }
 0x1b8   : > { %v1114_v53 = vpop.eup %1113  ;;  %v1031_v54 = vpop.f32.mrf.mxu1 }
 0x1b9   : > { %1127 = vrcp.f32 %v680_v50  ;;  %v679_v55 = vadd.f32 1.0, %v1114_v53  ;;  %v884_v56 = vmul.f32 -1.442695, %v593_v52  ;;  %v608_v57 = vadd.f32 %v1031_v54, %v1422_v21 }
 0x1ba   : > { %v1116_v58 = vpop.eup %1115  ;;  %1129 = vpow2.f32 %v885_v51  ;;  %v602_v59 = vpop.f32.mrf.mxu1 }
 0x1bb   : > { %1131 = vrcp.f32 %v679_v55  ;;  %v682_v60 = vadd.f32 1.0, %v1116_v58  ;;  %v887_v61 = vmul.f32 -1.442695, %v608_v57  ;;  %v603_v62 = vadd.f32 %v1422_v21, %v602_v59 }
 0x1bc   : > { %v1118_v63 = vpop.eup %1117  ;;  %1133 = vpow2.f32 %v884_v56  ;;  %v1034_v0 = vpop.f32.mrf.mxu1 }
 0x1bd   : > { %1135 = vrcp.f32 %v682_v60  ;;  %v681_v1 = vadd.f32 1.0, %v1118_v63  ;;  %v886_v2 = vmul.f32 -1.442695, %v603_v62  ;;  %v618_v3 = vadd.f32 %v1034_v0, %v1422_v21 }
 0x1be   : > { %v1120_v4 = vpop.eup %1119  ;;  %1137 = vpow2.f32 %v887_v61  ;;  %v612_v5 = vpop.f32.mrf.mxu1 }
 0x1bf   : > { %1139 = vrcp.f32 %v681_v1  ;;  %v684_v6 = vadd.f32 1.0, %v1120_v4  ;;  %v889_v7 = vmul.f32 -1.442695, %v618_v3  ;;  %v613_v8 = vadd.f32 %v1422_v21, %v612_v5 }
 0x1c0   : > { %v1122_v9 = vpop.eup %1121  ;;  %1141 = vpow2.f32 %v886_v2  ;;  %v1037_v10 = vpop.f32.mrf.mxu1 }
 0x1c1   : > { %1143 = vrcp.f32 %v684_v6  ;;  %v683_v11 = vadd.f32 1.0, %v1122_v9  ;;  %v888_v12 = vmul.f32 -1.442695, %v613_v8  ;;  %v628_v13 = vadd.f32 %v1037_v10, %v1422_v21 }
 0x1c2   : > { %v1124_v14 = vpop.eup %1123  ;;  %1145 = vpow2.f32 %v889_v7  ;;  %v622_v15 = vpop.f32.mrf.mxu1 }
 0x1c3   : > { %1147 = vrcp.f32 %v683_v11  ;;  %v686_v16 = vadd.f32 1.0, %v1124_v14  ;;  %v891_v17 = vmul.f32 -1.442695, %v628_v13  ;;  %v623_v18 = vadd.f32 %v1422_v21, %v622_v15 }
 0x1c4   : > { %v1126_v19 = vpop.eup %1125  ;;  %1149 = vpow2.f32 %v888_v12 }
 0x1c5   : > { %1151 = vrcp.f32 %v686_v16  ;;  %v685_v20 = vadd.f32 1.0, %v1126_v19  ;;  %v890_v22 = vmul.f32 -1.442695, %v623_v18 }
 0x1c6   : > { %v1128_v23 = vpop.eup %1127  ;;  %1153 = vpow2.f32 %v891_v17 }
 0x1c7   : > { %v1130_v24 = vpop.eup %1129  ;;  %v728_v25 = vmul.f32 4.0, %v1128_v23  ;;  %1155 = vrcp.f32 %v685_v20 }
 0x1c8   : > { %v1132_v26 = vpop.eup %1131  ;;  %v688_v27 = vadd.f32 1.0, %v1130_v24  ;;  %1157 = vpow2.f32 %v890_v22 }
 0x1c9   : > { %v1134_v28 = vpop.eup %1133  ;;  %v744_v29 = vadd.f32 1.0, %v728_v25  ;;  %v727_v30 = vmul.f32 4.0, %v1132_v26 }
 0x1ca   : > { %v1136_v31 = vpop.eup %1135  ;;  %1159 = vrcp.f32 %v688_v27  ;;  %v687_v21 = vadd.f32 1.0, %v1134_v28 }
 0x1cb   : > { %v1138_v32 = vpop.eup %1137  ;;  %760 = vst [vmem:[%s1443_s9 + $0x8] sm:$0xff] %v744_v29  ;;  %v743_v33 = vadd.f32 1.0, %v727_v30  ;;  %v730_v34 = vmul.f32 4.0, %v1136_v31 }
 0x1cc   : > { %v1140_v35 = vpop.eup %1139  ;;  %1161 = vrcp.f32 %v687_v21  ;;  %v690_v36 = vadd.f32 1.0, %v1138_v32 }
 0x1cd   : > { %v1142_v37 = vpop.eup %1141  ;;  %759 = vst [vmem:[%s1443_s9] sm:$0xff] %v743_v33  ;;  %v746_v38 = vadd.f32 1.0, %v730_v34  ;;  %v729_v39 = vmul.f32 4.0, %v1140_v35 }
 0x1ce   : > { %v1144_v40 = vpop.eup %1143  ;;  %1163 = vrcp.f32 %v690_v36  ;;  %v689_v41 = vadd.f32 1.0, %v1142_v37 }
 0x1cf   : > { %v1146_v42 = vpop.eup %1145  ;;  %762 = vst [vmem:[%s1443_s9 + $0x18] sm:$0xff] %v746_v38  ;;  %v745_v43 = vadd.f32 1.0, %v729_v39  ;;  %v732_v44 = vmul.f32 4.0, %v1144_v40 }
 0x1d0   : > { %v1148_v45 = vpop.eup %1147  ;;  %1165 = vrcp.f32 %v689_v41  ;;  %v692_v46 = vadd.f32 1.0, %v1146_v42 }
 0x1d1   : > { %v1150_v47 = vpop.eup %1149  ;;  %761 = vst [vmem:[%s1443_s9 + $0x10] sm:$0xff] %v745_v43  ;;  %v748_v48 = vadd.f32 1.0, %v732_v44  ;;  %v731_v49 = vmul.f32 4.0, %v1148_v45 }
 0x1d2   : > { %v1152_v50 = vpop.eup %1151  ;;  %1167 = vrcp.f32 %v692_v46  ;;  %v691_v51 = vadd.f32 1.0, %v1150_v47 }
 0x1d3   : > { %v1154_v52 = vpop.eup %1153  ;;  %764 = vst [vmem:[%s1443_s9 + $0x28] sm:$0xff] %v748_v48  ;;  %v747_v53 = vadd.f32 1.0, %v731_v49  ;;  %v734_v54 = vmul.f32 4.0, %v1152_v50 }
 0x1d4   : > { %v1156_v55 = vpop.eup %1155  ;;  %1169 = vrcp.f32 %v691_v51  ;;  %v694_v56 = vadd.f32 1.0, %v1154_v52 }
 0x1d5   : > { %v1158_v57 = vpop.eup %1157  ;;  %763 = vst [vmem:[%s1443_s9 + $0x20] sm:$0xff] %v747_v53  ;;  %v750_v58 = vadd.f32 1.0, %v734_v54  ;;  %v733_v59 = vmul.f32 4.0, %v1156_v55 }
 0x1d6   : > { %1171 = vrcp.f32 %v694_v56  ;;  %v693_v60 = vadd.f32 1.0, %v1158_v57 }
 0x1d7   : > { %v1160_v61 = vpop.eup %1159  ;;  %766 = vst [vmem:[%s1443_s9 + $0x38] sm:$0xff] %v750_v58  ;;  %v749_v62 = vadd.f32 1.0, %v733_v59 }
 0x1d8   : > { %v736_v63 = vmul.f32 4.0, %v1160_v61  ;;  %1173 = vrcp.f32 %v693_v60 }
 0x1d9   : > { %v1162_v0 = vpop.eup %1161  ;;  %765 = vst [vmem:[%s1443_s9 + $0x30] sm:$0xff] %v749_v62 }
 0x1da   : > { %v752_v1 = vadd.f32 1.0, %v736_v63  ;;  %v735_v2 = vmul.f32 4.0, %v1162_v0 }
 0x1db   : > { %v1164_v3 = vpop.eup %1163 }
 0x1dc   : > { %768 = vst [vmem:[%s1443_s9 + $0x48] sm:$0xff] %v752_v1  ;;  %v751_v4 = vadd.f32 1.0, %v735_v2  ;;  %v738_v5 = vmul.f32 4.0, %v1164_v3 }
 0x1dd   : > { %v1166_v6 = vpop.eup %1165 }
 0x1de   : > { %767 = vst [vmem:[%s1443_s9 + $0x40] sm:$0xff] %v751_v4  ;;  %v754_v7 = vadd.f32 1.0, %v738_v5  ;;  %v737_v8 = vmul.f32 4.0, %v1166_v6 }
 0x1df   : > { %v1168_v9 = vpop.eup %1167 }
 0x1e0   : > { %770 = vst [vmem:[%s1443_s9 + $0x58] sm:$0xff] %v754_v7  ;;  %v753_v10 = vadd.f32 1.0, %v737_v8  ;;  %v740_v11 = vmul.f32 4.0, %v1168_v9 }
 0x1e1   : > { %v1170_v12 = vpop.eup %1169 }
 0x1e2   : > { %769 = vst [vmem:[%s1443_s9 + $0x50] sm:$0xff] %v753_v10  ;;  %v756_v13 = vadd.f32 1.0, %v740_v11  ;;  %v739_v14 = vmul.f32 4.0, %v1170_v12 }
 0x1e3   : > { %v1172_v15 = vpop.eup %1171 }
 0x1e4   : > { %772 = vst [vmem:[%s1443_s9 + $0x68] sm:$0xff] %v756_v13  ;;  %v755_v16 = vadd.f32 1.0, %v739_v14  ;;  %v742_v17 = vmul.f32 4.0, %v1172_v15 }
 0x1e5   : > { %v1174_v18 = vpop.eup %1173 }
 0x1e6   : > { %771 = vst [vmem:[%s1443_s9 + $0x60] sm:$0xff] %v755_v16  ;;  %v758_v19 = vadd.f32 1.0, %v742_v17  ;;  %v741_v20 = vmul.f32 4.0, %v1174_v18 }
 0x1e8   : > { %774 = vst [vmem:[%s1443_s9 + $0x78] sm:$0xff] %v758_v19  ;;  %v757_v22 = vadd.f32 1.0, %v741_v20 }
 0x1ea   : > { %773 = vst [vmem:[%s1443_s9 + $0x70] sm:$0xff] %v757_v22 }
 0x1eb   : > { %1188 = shalt.err (!%p1185_p3)
}
 0x1ec   : > { %s1189_s23 = scalar_lea.hbm %s1464_s14, 2048  ;;  %s1193_s30 = scalar_lea.hbm %s1517_s5, 4096 }
 0x1ed   : > { %p1190_p4 = scmp.ne.s32.totalorder %s1464_s14, %s1189_s23  ;;  %p1194_p9 = scmp.lt.s32.totalorder %s1464_s14, %s1517_s5 }
 0x1ee   : > { %p1195_p10 = scmp.lt.s32.totalorder %s1193_s30, %s1189_s23 }
 0x1ef   : > { %p1191_p7 = pnand %p1190_p4, %p1308_p5 }
 0x1f0   : > { %p1196_p11 = por %p1195_p10, %p1194_p9 }
 0x1f1   : > { %p1192_p8 = pneg %p1191_p7 }
 0x1f3   : > { %p1197_p12 = pnand %p1196_p11, %p1192_p8 }
 0x1f5   : > { %1200 = shalt.err (!%p1197_p12)
}
 0x1f6   : > { %s1238_s9 = smov 128   ;;  %s1239_s10 = smov 8  }
 0x1f7   : > { %1070 = dma.vmem_to_hbm [thread:$0]  (%p1308_p5), %s1466_s11, 2048, %s1464_s14, %s1472_s22, %s1238_s9, %s1238_s9, %s1239_s10  }
 0x1f8 PF: > { %p1076_p13 = scmp.ge.s32.totalorder %s1235_s21, 2  ;;  %s804_s12 = sand.u32 1, %s1223_s18  }
 0x1f9   : > { %s805_s13 = scalar_lea.sflag [#allocation3], %s804_s12 }
 0x1fa   : > { %p1073_p0 = pnand %p1076_p13, %p1312_p6 }
 0x1fc   : > { %p1074_p1 = pneg %p1073_p0 }
 0x1fe   : > { %1218 = dma.done.wait (%p1074_p1), %s805_s13, 2048  }
 0x1ff   : > { %1220 = vsyncadd (%p1074_p1), %s805_s13, 4294965248  ;;  %p15_p2 = scmp.ge.s32.totalorder %s1295_s24, 4   ;;  %s1520_s18 = smov %s1227_s19 }
 0x200   : > { %s1521_s19 = smov %s1231_s20  ;;  %s1522_s20 = smov %s1306_s27 }
 0x201   : > { %s1523_s21 = smov %s1295_s24  ;;  %17 = sbr.rel (!%p15_p2) target bundleno = 3 (0x3), region = 75 }
 0x206   :  { %810 = vsyncpa [#allocation3], 1 }
 0x207   :  { %812 = vsyncpa [#allocation3 + $0x1], 1 }

</bundles_post_ra>
